<compile_context>
chip_gen: v7x
topology: tpu7x:2x2x1
jax: 0.10.0
libtpu: 0.0.40
codegen_flags: <defaults>
</compile_context>

<pallas_src>
import functools

import jax
import jax.numpy as jnp
from jax.experimental import pallas as pl
from jax.experimental.pallas import tpu as pltpu


def _tpu_vmem_capacity_bytes():
    try:
        return int(pltpu.get_tpu_info().vmem_capacity_bytes)
    except Exception:
        return 64 * 1024 * 1024  # conservative fallback (v7x-sized)


# ---------------------------------------------------------------------------
# Fused path: one grid step per sample, whole slab resident in VMEM.
# Exact centered statistics; single HBM read + single HBM write.
# ---------------------------------------------------------------------------

def _layernorm_fused_kernel(x_ref, w_ref, b_ref, o_ref, *, eps, inv_n):
    x = x_ref[...].astype(jnp.float32)          # cast in vregs (free), not in HBM
    mean = jnp.sum(x) * inv_n
    d = x - mean
    var = jnp.sum(d * d) * inv_n                # exact centered variance
    inv_std = jax.lax.rsqrt(var + eps)          # EUP slot
    a = w_ref[...] * inv_std                    # fold affine; do NOT reuse `d`
    o_ref[...] = (x * a + (b_ref[...] - mean * a)).astype(o_ref.dtype)


def _layernorm_fused(x3, w3, b3, eps, vmem_limit):
    N, R, L = x3.shape
    inv_n = 1.0 / float(R * L)
    return pl.pallas_call(
        functools.partial(_layernorm_fused_kernel, eps=eps, inv_n=inv_n),
        out_shape=jax.ShapeDtypeStruct((N, R, L), x3.dtype),
        grid_spec=pltpu.PrefetchScalarGridSpec(
            num_scalar_prefetch=0,
            grid=(N,),
            in_specs=[
                pl.BlockSpec((1, R, L), lambda n: (n, 0, 0)),
                pl.BlockSpec((1, w3.shape[1], w3.shape[2]), lambda n: (0, 0, 0)),
                pl.BlockSpec((1, b3.shape[1], b3.shape[2]), lambda n: (0, 0, 0)),
            ],
            out_specs=pl.BlockSpec((1, R, L), lambda n: (n, 0, 0)),
        ),
        compiler_params=pltpu.CompilerParams(
            dimension_semantics=("parallel",),
            vmem_limit_bytes=vmem_limit,
        ),
    )(x3, w3, b3)


# ---------------------------------------------------------------------------
# Tiled path: per-(sample, HW-tile) partial sums (fully parallel grid), tiny
# host combine, then ONE folded scale/shift pass  y = x*(w/std) + (b - mean*w/std).
# ---------------------------------------------------------------------------

def _layernorm_stats_kernel(x_ref, s_ref, sq_ref, *, hw, tile_hw, ragged):
    x = x_ref[...].astype(jnp.float32)          # (1, C, tile_hw)
    if ragged:
        # mask lanes past the true HW extent (edge block holds unspecified data)
        lane = jax.lax.broadcasted_iota(jnp.int32, x.shape, 2)
        x = jnp.where(pl.program_id(1) * tile_hw + lane < hw, x, 0.0)
    # Per-tile partial sums (no sequential carry) -> both grid axes parallel.
    s_ref[...] = jnp.sum(x, axis=(0, 1, 2), keepdims=True)
    sq_ref[...] = jnp.sum(x * x, axis=(0, 1, 2), keepdims=True)


def _scale_shift_kernel(x_ref, sc_ref, sh_ref, o_ref):
    x = x_ref[...].astype(jnp.float32)
    o_ref[...] = (x * sc_ref[...] + sh_ref[...]).astype(o_ref.dtype)


def _layernorm_tiled(x3, w, b, eps, tile_hw, vmem_limit):
    N, C, HW = x3.shape
    n_tiles = (HW + tile_hw - 1) // tile_hw
    ragged = (HW % tile_hw) != 0

    s, sq = pl.pallas_call(
        functools.partial(_layernorm_stats_kernel,
                          hw=HW, tile_hw=tile_hw, ragged=ragged),
        out_shape=[jax.ShapeDtypeStruct((N * n_tiles, 1, 1), jnp.float32),
                   jax.ShapeDtypeStruct((N * n_tiles, 1, 1), jnp.float32)],
        grid_spec=pltpu.PrefetchScalarGridSpec(
            num_scalar_prefetch=0,
            grid=(N, n_tiles),
            in_specs=[pl.BlockSpec((1, C, tile_hw), lambda n, t: (n, 0, t))],
            out_specs=[pl.BlockSpec((1, 1, 1), lambda n, t: (n * n_tiles + t, 0, 0)),
                       pl.BlockSpec((1, 1, 1), lambda n, t: (n * n_tiles + t, 0, 0))],
        ),
        compiler_params=pltpu.CompilerParams(
            dimension_semantics=("parallel", "parallel"),
            vmem_limit_bytes=vmem_limit,
        ),
    )(x3)

    cnt = float(C * HW)
    s = jnp.sum(s.reshape(N, n_tiles), axis=1)
    sq = jnp.sum(sq.reshape(N, n_tiles), axis=1)
    mean = s / cnt
    # TODO(synk): one-pass E[x^2]-E[x]^2 can lose precision for extreme-mean
    # inputs; the fused path (used whenever a sample fits VMEM) is exact-centered.
    var = jnp.maximum(sq / cnt - mean * mean, 0.0)
    inv_std = jax.lax.rsqrt(var + eps)                              # (N,)

    scale2 = w.reshape(1, C) * inv_std.reshape(N, 1)                # (N, C)
    shift2 = b.reshape(1, C) - mean.reshape(N, 1) * scale2          # (N, C)
    scale = scale2.reshape(N, C, 1)
    shift = shift2.reshape(N, C, 1)

    return pl.pallas_call(
        _scale_shift_kernel,
        out_shape=jax.ShapeDtypeStruct((N, C, HW), x3.dtype),
        grid_spec=pltpu.PrefetchScalarGridSpec(
            num_scalar_prefetch=0,
            grid=(N, n_tiles),
            in_specs=[pl.BlockSpec((1, C, tile_hw), lambda n, t: (n, 0, t)),
                      pl.BlockSpec((1, C, 1), lambda n, t: (n, 0, 0)),
                      pl.BlockSpec((1, C, 1), lambda n, t: (n, 0, 0))],
            out_specs=pl.BlockSpec((1, C, tile_hw), lambda n, t: (n, 0, t)),
        ),
        compiler_params=pltpu.CompilerParams(
            dimension_semantics=("parallel", "parallel"),
            vmem_limit_bytes=vmem_limit,
        ),
    )(x3, scale, shift)


# ---------------------------------------------------------------------------
# Budgeting / dispatch
# ---------------------------------------------------------------------------

def _fused_working_set_bytes(C, HW, itemsize, flatten, sub):
    if flatten:
        # 2x in + 2x out double buffers (native) + f32 weight & bias slabs + ~1 f32 temp
        return C * HW * (4 * itemsize + 3 * 4)
    cpad = -(-C // sub) * sub                      # sublane-padded channel count
    # 2x in + 2x out double buffers (native) + ~1 f32 temp  (== 5 slabs for f32)
    return cpad * HW * (4 * itemsize + 4)


def _pick_tile(HW, C, itemsize, vmem_limit, two_core):
    sub = 8 * max(1, 4 // itemsize)
    cpad = -(-C // sub) * sub
    # Bigger tiles on v7x-like chips (3.2 TB/s HBM -> amortize ~0.35us/step).
    target = (4 << 20) if two_core else (2 << 20)
    per_lane = cpad * (4 * itemsize + 4)           # scale/shift working set per lane
    t = min(target // (cpad * itemsize), (vmem_limit // 2) // per_lane)
    t = max(128, (int(t) // 128) * 128)
    hw_ceil = -(-HW // 128) * 128
    return min(t, hw_ceil)


def layer_norm(x_nchw, weight, bias, *, eps=1e-5, tile_hw=None, force_tiled=False):
    """LayerNorm over (C, H, W) per sample with per-channel affine (NCHW in/out)."""
    N, C, H, W = x_nchw.shape
    HW = H * W
    itemsize = jnp.dtype(x_nchw.dtype).itemsize
    w = weight.reshape(-1).astype(jnp.float32)      # (C,), tiny host-side cast
    b = bias.reshape(-1).astype(jnp.float32)        # (C,)

    cap = _tpu_vmem_capacity_bytes()
    vmem_limit = int(cap * 0.8)                     # leave headroom for Mosaic scratch
    two_core = cap <= 64 * 1024 * 1024              # v7x-like: 2 TCs share the grid
    sub = 8 * max(1, 4 // itemsize)                 # sublane tile: 8 f32 / 16 bf16

    # When C underfills the sublane tile but C*HW packs exactly into (sub, 128k),
    # re-view the per-sample slab densely and pre-expand weight/bias once.
    flatten = (C % sub != 0) and ((C * HW) % (sub * 128) == 0)
    ws = _fused_working_set_bytes(C, HW, itemsize, flatten, sub)
    slab_bytes = C * HW * itemsize
    use_fused = (
        (not force_tiled)
        and ws <= vmem_limit
        # N=1 + big slab on a 2-TC chip: the tiled (parallel-grid) path uses both cores.
        and not (two_core and N < 2 and slab_bytes > (2 << 20))
    )

    x3 = x_nchw.reshape(N, C, HW)                   # pure reshape, native dtype

    if use_fused:
        if flatten:
            R = sub
            L = (C * HW) // R                       # multiple of 128 by construction
            wf = jnp.broadcast_to(w[:, None], (C, HW)).reshape(1, R, L)
            bf = jnp.broadcast_to(b[:, None], (C, HW)).reshape(1, R, L)
            y = _layernorm_fused(x3.reshape(N, R, L), wf, bf, eps, vmem_limit)
        else:
            y = _layernorm_fused(x3, w.reshape(1, C, 1), b.reshape(1, C, 1),
                                 eps, vmem_limit)
        return y.reshape(N, C, H, W)

    t = tile_hw if tile_hw is not None else _pick_tile(HW, C, itemsize, vmem_limit, two_core)
    t = max(128, (int(t) // 128) * 128)
    y3 = _layernorm_tiled(x3, w, b, eps, t, vmem_limit)
    return y3.reshape(N, C, H, W)


def layer_norm_ref(x, weight, bias, eps=1e-5):
    mean = jnp.mean(x, axis=(1, 2, 3), keepdims=True)
    std = jnp.sqrt(jnp.mean((x - mean) ** 2, axis=(1, 2, 3), keepdims=True) + eps)
    C = x.shape[1]
    return (x - mean) / std * weight.reshape(1, C, 1, 1) + bias.reshape(1, C, 1, 1)


# ---------------------------------------------------------------------------

if __name__ == "__main__":
    # 1) Small shapes consistent with the module: batch=2, channels=4, spatial=16.
    #    (f32, C=4 -> exercises the flattened (N, 8, 128) fused path.)
    N, C, H, W = 2, 4, 16, 16
    key = jax.random.PRNGKey(0)
    kx, kw, kb = jax.random.split(key, 3)
    x = jax.random.normal(kx, (N, C, H, W), jnp.float32)
    weight = 1.0 + 0.1 * jax.random.normal(kw, (1, C, 1, 1), jnp.float32)
    bias = 0.1 * jax.random.normal(kb, (1, C, 1, 1), jnp.float32)

    out = layer_norm(x, weight, bias)
    jax.block_until_ready(out)
    assert out.shape == (N, C, H, W) and out.dtype == x.dtype
    ref = layer_norm_ref(x, weight, bias)
    assert bool(jnp.isfinite(out).all())
    assert bool(jnp.allclose(out, ref, atol=1e-4, rtol=1e-4)), \
        float(jnp.max(jnp.abs(out - ref)))

    # 2) bf16 input -> exercises in-kernel casting and the channel-layout fused path.
    xb = x.astype(jnp.bfloat16)
    outb = layer_norm(xb, weight, bias)
    jax.block_until_ready(outb)
    assert outb.dtype == jnp.bfloat16
    refb = layer_norm_ref(xb.astype(jnp.float32), weight, bias)
    assert bool(jnp.allclose(outb.astype(jnp.float32), refb, atol=0.05, rtol=0.05)), \
        float(jnp.max(jnp.abs(outb.astype(jnp.float32) - refb)))

    # 3) Forced tiled path with a ragged HW tail (HW=1920, tile=512): exercises the
    #    parallel per-tile stats partials, in-kernel lane masking, and edge writes.
    N2, C2, H2, W2 = 2, 8, 48, 40
    x2 = jax.random.normal(jax.random.PRNGKey(1), (N2, C2, H2, W2), jnp.float32)
    w2 = 1.0 + 0.05 * jax.random.normal(jax.random.PRNGKey(2), (1, C2, 1, 1), jnp.float32)
    b2 = 0.05 * jax.random.normal(jax.random.PRNGKey(3), (1, C2, 1, 1), jnp.float32)
    out2 = layer_norm(x2, w2, b2, force_tiled=True, tile_hw=512)
    jax.block_until_ready(out2)
    ref2 = layer_norm_ref(x2, w2, b2)
    assert bool(jnp.allclose(out2, ref2, atol=1e-4, rtol=1e-4)), \
        float(jnp.max(jnp.abs(out2 - ref2)))

    print("KERNEL_OK")
</pallas_src>

<mosaic_0001>
module attributes {stable_mosaic.version = 11 : i64} {
  func.func @_layernorm_fused_kernel(%arg0: i32, %arg1: memref<1x8x128xf32, #tpu.memory_space<vmem>>, %arg2: memref<1x8x128xf32, #tpu.memory_space<vmem>>, %arg3: memref<1x8x128xf32, #tpu.memory_space<vmem>>, %arg4: memref<1x8x128xf32, #tpu.memory_space<vmem>>) attributes {dimension_semantics = [#tpu.dimension_semantics<parallel>], iteration_bounds = array<i64: 2>, scalar_prefetch = 0 : i64, scratch_operands = 0 : i64, tpu.core_type = #tpu.core_type<tc>, window_params = [{transform_indices = @transform_0, window_bounds = array<i64: 1, 8, 128>}, {pipeline_mode = #tpu.pipeline_mode<synchronous>, transform_indices = @transform_1, window_bounds = array<i64: 1, 8, 128>}, {pipeline_mode = #tpu.pipeline_mode<synchronous>, transform_indices = @transform_2, window_bounds = array<i64: 1, 8, 128>}, {transform_indices = @transform_3, window_bounds = array<i64: 1, 8, 128>}]} {
    %c0 = arith.constant 0 : index
    %c0_0 = arith.constant 0 : index
    %c0_1 = arith.constant 0 : index
    %0 = vector.load %arg1[%c0, %c0_0, %c0_1] : memref<1x8x128xf32, #tpu.memory_space<vmem>>, vector<1x8x128xf32>
    %1 = vector.shape_cast %0 : vector<1x8x128xf32> to vector<1x1x8x128xf32>
    %cst = arith.constant dense<0.000000e+00> : vector<1xf32>
    %2 = vector.multi_reduction <add>, %1, %cst [1, 2, 3] : vector<1x1x8x128xf32> to vector<1xf32>
    %3 = vector.shape_cast %2 : vector<1xf32> to vector<1x1x1x1xf32>
    %4 = vector.extract %3[0, 0, 0, 0] : f32 from vector<1x1x1x1xf32>
    %cst_2 = arith.constant 9.765625E-4 : f32
    %5 = arith.mulf %4, %cst_2 : f32
    %6 = vector.broadcast %5 : f32 to vector<1x8x128xf32>
    %7 = arith.subf %0, %6 : vector<1x8x128xf32>
    %8 = arith.mulf %7, %7 : vector<1x8x128xf32>
    %9 = vector.shape_cast %8 : vector<1x8x128xf32> to vector<1x1x8x128xf32>
    %cst_3 = arith.constant dense<0.000000e+00> : vector<1xf32>
    %10 = vector.multi_reduction <add>, %9, %cst_3 [1, 2, 3] : vector<1x1x8x128xf32> to vector<1xf32>
    %11 = vector.shape_cast %10 : vector<1xf32> to vector<1x1x1x1xf32>
    %12 = vector.extract %11[0, 0, 0, 0] : f32 from vector<1x1x1x1xf32>
    %cst_4 = arith.constant 9.765625E-4 : f32
    %13 = arith.mulf %12, %cst_4 : f32
    %cst_5 = arith.constant 9.99999974E-6 : f32
    %14 = arith.addf %13, %cst_5 : f32
    %15 = math.rsqrt %14 : f32
    %c0_6 = arith.constant 0 : index
    %c0_7 = arith.constant 0 : index
    %c0_8 = arith.constant 0 : index
    %16 = vector.load %arg2[%c0_6, %c0_7, %c0_8] : memref<1x8x128xf32, #tpu.memory_space<vmem>>, vector<1x8x128xf32>
    %17 = vector.broadcast %15 : f32 to vector<1x8x128xf32>
    %18 = arith.mulf %16, %17 : vector<1x8x128xf32>
    %19 = arith.mulf %0, %18 : vector<1x8x128xf32>
    %c0_9 = arith.constant 0 : index
    %c0_10 = arith.constant 0 : index
    %c0_11 = arith.constant 0 : index
    %20 = vector.load %arg3[%c0_9, %c0_10, %c0_11] : memref<1x8x128xf32, #tpu.memory_space<vmem>>, vector<1x8x128xf32>
    %21 = vector.broadcast %5 : f32 to vector<1x8x128xf32>
    %22 = arith.mulf %21, %18 : vector<1x8x128xf32>
    %23 = arith.subf %20, %22 : vector<1x8x128xf32>
    %24 = arith.addf %19, %23 : vector<1x8x128xf32>
    %c0_12 = arith.constant 0 : index
    %c0_13 = arith.constant 0 : index
    %c0_14 = arith.constant 0 : index
    %25 = vector.load %arg4[%c0_12, %c0_13, %c0_14] : memref<1x8x128xf32, #tpu.memory_space<vmem>>, vector<1x8x128xf32>
    tpu.vector_store %arg4[%c0_12, %c0_13, %c0_14], %24 {strides = array<i32>} : memref<1x8x128xf32, #tpu.memory_space<vmem>>, vector<1x8x128xf32>,
    return
  }
  func.func @transform_0(%arg0: i32) -> (i32, i32, i32) {
    %c0_i32 = arith.constant 0 : i32
    %c0_i32_0 = arith.constant 0 : i32
    %c0_i32_1 = arith.constant 0 : i32
    return %arg0, %c0_i32, %c0_i32_0 : i32, i32, i32
  }
  func.func @transform_1(%arg0: i32) -> (i32, i32, i32) {
    %c0_i32 = arith.constant 0 : i32
    %c0_i32_0 = arith.constant 0 : i32
    %c0_i32_1 = arith.constant 0 : i32
    %c0_i32_2 = arith.constant 0 : i32
    return %c0_i32, %c0_i32_0, %c0_i32_1 : i32, i32, i32
  }
  func.func @transform_2(%arg0: i32) -> (i32, i32, i32) {
    %c0_i32 = arith.constant 0 : i32
    %c0_i32_0 = arith.constant 0 : i32
    %c0_i32_1 = arith.constant 0 : i32
    %c0_i32_2 = arith.constant 0 : i32
    return %c0_i32, %c0_i32_0, %c0_i32_1 : i32, i32, i32
  }
  func.func @transform_3(%arg0: i32) -> (i32, i32, i32) {
    %c0_i32 = arith.constant 0 : i32
    %c0_i32_0 = arith.constant 0 : i32
    %c0_i32_1 = arith.constant 0 : i32
    return %arg0, %c0_i32, %c0_i32_0 : i32, i32, i32
  }
}

</mosaic_0001>

<bundles_post_ra>
// kernel: tpu_custom_call.1
= control target key start
LH: loop header
LB: loop body
LE: loop exit
PB: predicated region body
PF: predicated region fallthrough
CT: control target
= control target key end

     0   :  { %8 = vsyncpa [#allocation3], 0  ;;  %s853_s0 = inlined_call_operand.hbm [shape: f32[2,8,128], index: 0, kind: input, shape index: {}]   ;;  %s854_s1 = inlined_call_operand.hbm [shape: f32[1,8,128], index: 1, kind: input, shape index: {}]   ;;  %s855_s2 = inlined_call_operand.hbm [shape: f32[1,8,128], index: 2, kind: input, shape index: {}]   ;;  %s856_s3 = inlined_call_operand.hbm [shape: f32[2,8,128], index: 3, kind: output, shape index: {}]  }
   0x1   :  { %10 = vsyncpa [#allocation3 + $0x1], 0 }
   0x2   :  { %11 = vsyncpa [#allocation6], 0 }
   0x3   :  { %12 = vsyncpa [#allocation4], 0 }
   0x4   :  { %14 = vsyncpa [#allocation4 + $0x1], 0  ;;  %s624_s12 = smov 0   ;;  %s626_s13 = smov 0  }
   0x5   :  { %s628_s14 = smov 0   ;;  %s630_s15 = smov 0  }
   0x6 LB: > { %s645_s16 = sadd.s32 4294967295, %s598_s15   ;;  %s351_s17 = sadd.s32 4294967294, %s598_s15   ;;  %s598_s15 = sphi %s630_s15, %s876_s15   ;;  %s594_s14 = sphi %s628_s14, %s875_s14   ;;  %s590_s13 = sphi %s626_s13, %s874_s13   ;;  %s586_s12 = sphi %s624_s12, %s873_s12  }
   0x7   : > { %p40_p0 = scmp.ne.s32.totalorder %s590_s13, %s586_s12  ;;  %p857_p1 = scmp.eq.s32.totalorder %s645_s16, 0 }
   0x8   : > { %p112_p3 = scmp.eq.s32.totalorder %s351_s17, 1  ;;  %p352_p5 = scmp.ge.s32.totalorder %s598_s15, 1 }
   0x9   : > { %p654_p4 = por %p857_p1, %p40_p0  ;;  %p119_p7 = scmp.lt.s32.totalorder %s598_s15, 3 }
   0xa   : > { %p659_p6 = por %p112_p3, %p40_p0  ;;  %s600_s21 = smov [#allocation5]  }
   0xb   : > { %s860_s18 = scalar_select %p654_p4, 1, 0 }
   0xc   : > { %s861_s19 = scalar_select %p659_p6, 1, 0 }
   0xd   : > { %p664_p8 = pnand %p352_p5, %p119_p7  ;;  %s132_s22 = sshll.u32 %s600_s21, 4  ;;  %s133_s22 = int_to_ptr.vmem [resolvable:$true] %s132_s22 }
   0xe   : > { %s601_s23 = smov [#allocation7]   ;;  %s680_s26 = sadd.s32 1, %s598_s15  }
   0xf   : > { %s862_s20 = scalar_select %p664_p8, 1, 0 }
  0x10   : > { %p385_p10 = pneg %p664_p8  ;;  %s143_s24 = sshll.u32 %s601_s23, 4  ;;  %s677_s24 = int_to_ptr.vmem [resolvable:$true] %s143_s24 }
  0x11   : > { %s24_s27 = ssub.s32 %s598_s15, %s680_s26  ;;  %s442_s30 = scalar_lea.hbm %s854_s1, 128 }
  0x12   : > { %p673_p11 = pnand %p385_p10, %p857_p1  ;;  %p443_p12 = scmp.ne.s32.totalorder %s854_s1, %s442_s30 }
  0x13   : > { %p449_p5 = scmp.lt.u32.totalorder %s442_s30, %s854_s1 }
  0x14   : > { %p444_p13 = pneg %p673_p11 }
  0x16   : > { %p445_p0 = pnand %p444_p13, %p443_p12 }
  0x18   : > { %p446_p3 = pneg %p445_p0 }
  0x1a   : > { %p451_p7 = pnand %p449_p5, %p446_p3 }
  0x1c   : > { %454 = shalt.err (!%p451_p7)
}
  0x1d   : > { %s455_s8 = scalar_lea.vmem %s133_s22, 128  ;;  %p463_p2 = scmp.lt.s32.totalorder %s133_s22, %s133_s22 }
  0x1e   : > { %p456_p10 = scmp.ne.s32.totalorder %s133_s22, %s455_s8  ;;  %p464_p6 = scmp.lt.s32.totalorder %s455_s8, %s455_s8 }
  0x20   : > { %p458_p9 = pnand %p456_p10, %p444_p13  ;;  %p465_p4 = por %p464_p6, %p463_p2 }
  0x22   : > { %p459_p1 = pneg %p458_p9 }
  0x24   : > { %p466_p8 = pnand %p465_p4, %p459_p1 }
  0x26   : > { %469 = shalt.err (!%p466_p8)
}
  0x27   : > { %388 = dma.hbm_to_vmem [thread:$0]  (!%p673_p11), %s854_s1, 128, %s133_s22, [#allocation6]  }
  0x28   : > { %s470_s21 = scalar_lea.hbm %s855_s2, 128 }
  0x29   : > { %p471_p9 = scmp.ne.s32.totalorder %s855_s2, %s470_s21  ;;  %p477_p4 = scmp.lt.u32.totalorder %s470_s21, %s855_s2 }
  0x2b   : > { %p473_p2 = pnand %p471_p9, %p444_p13 }
  0x2d   : > { %p474_p1 = pneg %p473_p2 }
  0x2f   : > { %p479_p6 = pnand %p477_p4, %p474_p1 }
  0x31   : > { %482 = shalt.err (!%p479_p6)
}
  0x32   : > { %s483_s22 = scalar_lea.vmem %s677_s24, 128  ;;  %p491_p3 = scmp.lt.s32.totalorder %s677_s24, %s677_s24 }
  0x33   : > { %p484_p8 = scmp.ne.s32.totalorder %s677_s24, %s483_s22  ;;  %p492_p5 = scmp.lt.s32.totalorder %s483_s22, %s483_s22 }
  0x35   : > { %p486_p12 = pnand %p484_p8, %p444_p13  ;;  %p493_p7 = por %p492_p5, %p491_p3 }
  0x37   : > { %p487_p0 = pneg %p486_p12 }
  0x39   : > { %p494_p10 = pnand %p493_p7, %p487_p0 }
  0x3b   : > { %497 = shalt.err (!%p494_p10)
}
  0x3c   : > { %391 = dma.hbm_to_vmem [thread:$0]  (!%p673_p11), %s855_s2, 128, %s677_s24, [#allocation6]  }
  0x3d   : > { %p25_p13 = scmp.eq.s32.totalorder %s24_s27, 0  ;;  %s27_s6 = sadd.s32 1, %s594_s14 }
  0x3e   : > { %p34_p9 = scmp.ne.s32.totalorder %s594_s14, %s590_s13  ;;  %p35_p2 = scmp.eq.s32.totalorder %s598_s15, 0 }
  0x3f   : > { %s739_s25 = scalar_select %p25_p13, %s594_s14, %s27_s6  }
  0x40   : > { %p36_p1 = por %p35_p2, %p34_p9  ;;  %p864_p4 = scmp.eq.s32.totalorder %s645_s16, 1 }
  0x41   : > { %p402_p8 = scmp.lt.s32.totalorder %s598_s15, 2  ;;  %s154_s8 = sand.u32 1, %s594_s14  }
  0x42   : > { %p743_p6 = por %p864_p4, %p34_p9  ;;  %s356_s9 = sshll.u32 %s154_s8, 3 }
  0x43   : > { %s357_s10 = sshll.u32 %s598_s15, 7  ;;  %s158_s27 = scalar_lea.vmem [#allocation2], %s356_s9 }
  0x44   : > { %s753_s24 = scalar_lea.hbm %s853_s0, %s357_s10  ;;  %s165_s21 = sshll.u32 %s158_s27, 4  ;;  %s755_s21 = int_to_ptr.vmem [resolvable:$true] %s165_s21 }
  0x45   : > { %p757_p11 = pnand %p402_p8, %p36_p1  ;;  %s155_s28 = scalar_lea.sflag [#allocation3], %s154_s8 }
  0x46   : > { %s498_s29 = scalar_lea.hbm %s753_s24, 128  ;;  %s503_s4 = scalar_lea.hbm %s853_s0, 256 }
  0x47   : > { %p499_p12 = scmp.ne.s32.totalorder %s753_s24, %s498_s29  ;;  %p500_p0 = pneg %p757_p11 }
  0x48   : > { %p504_p7 = scmp.lt.u32.totalorder %s753_s24, %s853_s0  ;;  %p505_p10 = scmp.lt.u32.totalorder %s503_s4, %s498_s29 }
  0x49   : > { %p501_p3 = pnand %p500_p0, %p499_p12  ;;  %p507_p9 = scmp.lt.u32.totalorder %s498_s29, %s753_s24 }
  0x4a   : > { %p506_p13 = por %p505_p10, %p504_p7 }
  0x4b   : > { %p502_p5 = pneg %p501_p3 }
  0x4c   : > { %p508_p2 = por %p507_p9, %p506_p13 }
  0x4e   : > { %p509_p1 = pnand %p508_p2, %p502_p5 }
  0x50   : > { %512 = shalt.err (!%p509_p1)
}
  0x51   : > { %s513_s8 = scalar_lea.vmem %s755_s21, 128  ;;  %s602_s9 = smov [#allocation2]  }
  0x52   : > { %p514_p4 = scmp.ne.s32.totalorder %s755_s21, %s513_s8  ;;  %s518_s10 = sshll.u32 %s602_s9, 4  ;;  %s519_s10 = int_to_ptr.vmem [resolvable:$false] %s518_s10 }
  0x53   : > { %s520_s11 = scalar_lea.vmem %s519_s10, 256  ;;  %p521_p3 = scmp.lt.s32.totalorder %s755_s21, %s519_s10 }
  0x54   : > { %p516_p8 = pnand %p514_p4, %p500_p0  ;;  %p522_p7 = scmp.lt.s32.totalorder %s520_s11, %s513_s8 }
  0x56   : > { %p517_p12 = pneg %p516_p8  ;;  %p523_p10 = por %p522_p7, %p521_p3 }
  0x58   : > { %p524_p13 = pnand %p523_p10, %p517_p12 }
  0x5a   : > { %527 = shalt.err (!%p524_p13)
}
  0x5b   : > { %395 = dma.hbm_to_vmem [thread:$0]  (!%p757_p11), %s753_s24, 128, %s755_s21, %s155_s28  }
  0x5c   : > { %p867_p5 = scmp.ne.s32.totalorder %s862_s20, 0 }
  0x5d   : > { %s789_s17 = sand.u32 (!%p867_p5), 1, %s590_s13   ;;  %p868_p0 = scmp.ne.s32.totalorder (!%p867_p5), %s860_s18, 0 }
  0x5e   : > { %174 = sbr.rel (%p867_p5) target bundleno = 610 (0x262), region = 32  ;;  %s359_s27 = sshll.u32 (!%p867_p5), %s789_s17, 3 }
  0x5f   : > { %s177_s29 = scalar_lea.sflag (!%p867_p5), [#allocation3], %s789_s17  ;;  %s180_s30 = scalar_lea.vmem (!%p867_p5), [#allocation2], %s359_s27 }
  0x65   : > { %573 = dma.done.wait (%p868_p0), %s177_s29, 128  }
  0x66   : > { %575 = vsyncadd (%p868_p0), %s177_s29, 4294967168  ;;  %p869_p11 = scmp.eq.s32.totalorder %s645_s16, 0 }
  0x68   : > { %577 = dma.done.wait (%p869_p11), [#allocation6], 256   ;;  %p870_p9 = pmov %p869_p11 }
  0x69   : > { %v211_v0 = vld [vmem:[%s180_s30] sm:$0xff]  ;;  %v239_v20 = vld [vmem:[#allocation5] sm:$0xff]  ;;  %v243_v23 = vld [vmem:[#allocation7] sm:$0xff]  ;;  %s364_s22 = sshll.u32 %s645_s16, 7  ;;  %s210_s4 = scalar_lea.vmem [#allocation8], %s359_s27 }
  0x6a   : > { %579 = vsyncadd (%p870_p9), [#allocation6], 4294967040  ;;  %212 = vadd.xlane.f32.xlu0 %v211_v0  ;;  %s262_s5 = sshll.u32 %s210_s4, 4  ;;  %s809_s9 = scalar_lea.hbm %s856_s3, %s364_s22  ;;  %s811_s5 = int_to_ptr.vmem [resolvable:$true] %s262_s5 }
  0x6b   : > { %s249_s10 = scalar_lea.sflag [#allocation4], %s789_s17  ;;  %s528_s11 = scalar_lea.vmem %s811_s5, 128 }
  0x6c   : > { %p529_p2 = scmp.ne.s32.totalorder %s811_s5, %s528_s11  ;;  %s603_s16 = smov [#allocation8]  }
  0x6d   : > { %s532_s27 = sshll.u32 %s603_s16, 4  ;;  %s533_s27 = int_to_ptr.vmem [resolvable:$false] %s532_s27 }
  0x6e   : > { %p530_p1 = pnand %p529_p2, %p743_p6  ;;  %s534_s29 = scalar_lea.vmem %s533_s27, 256 }
  0x6f   : > { %p535_p8 = scmp.lt.s32.totalorder %s811_s5, %s533_s27  ;;  %p536_p12 = scmp.lt.s32.totalorder %s534_s29, %s528_s11 }
  0x70   : > { %p531_p4 = pneg %p530_p1 }
  0x71   : > { %p537_p3 = por %p536_p12, %p535_p8 }
  0x73   : > { %p538_p7 = pnand %p537_p3, %p531_p4 }
  0xf7   : > { %v213_v1 = vpop.xlane.xlu0 %212 }
  0xf8   : > { %v214_v2 = vrot.slane %v213_v1, 4 }
  0xfa   : > { %v215_v3 = vadd.f32 %v214_v2, %v213_v1 }
  0xfc   : > { %v216_v4 = vrot.slane %v215_v3, 2 }
  0xfe   : > { %v217_v5 = vadd.f32 %v216_v4, %v215_v3 }
 0x100   : > { %v218_v6 = vrot.slane %v217_v5, 1 }
 0x102   : > { %v219_v7 = vadd.f32 %v218_v6, %v217_v5 }
 0x104   : > { %367 = vpush %v219_v7 }
 0x135   : > { %s368_s20 = spop %367 }
 0x136   : > { %s221_s24 = smul.f32 0.0009765625, %s368_s20 }
 0x138   : > { %v222_v8 = vstv %s221_s24 }
 0x139   : > { %v223_v9 = vsub.f32 %v211_v0, %v222_v8 }
 0x13b   : > { %v224_v10 = vmul.f32 %v223_v9, %v223_v9 }
 0x13d   : > { %225 = vadd.xlane.f32.xlu0 %v224_v10 }
 0x1ca   : > { %v226_v11 = vpop.xlane.xlu0 %225 }
 0x1cb   : > { %v227_v12 = vrot.slane %v226_v11, 4 }
 0x1cd   : > { %v228_v13 = vadd.f32 %v227_v12, %v226_v11 }
 0x1cf   : > { %v229_v14 = vrot.slane %v228_v13, 2 }
 0x1d1   : > { %v230_v15 = vadd.f32 %v229_v14, %v228_v13 }
 0x1d3   : > { %v231_v16 = vrot.slane %v230_v15, 1 }
 0x1d5   : > { %v232_v17 = vadd.f32 %v231_v16, %v230_v15 }
 0x1d7   : > { %369 = vpush %v232_v17 }
 0x208   : > { %s370_s18 = spop %369 }
 0x209   : > { %s234_s21 = smul.f32 0.0009765625, %s370_s18 }
 0x20b   : > { %s235_s23 = sadd.f32 1e-05, %s234_s21 }
 0x20d   : > { %v236_v18 = vstv %s235_s23 }
 0x20e   : > { %440 = vrsqrt.f32 %v236_v18 }
 0x218   : > { %v441_v19 = vpop.eup %440 }
 0x219   : > { %371 = vpush %v441_v19 }
 0x24a   : > { %s372_s28 = spop %371 }
 0x24b   : > { %v240_v21 = vstv %s372_s28 }
 0x24c   : > { %v241_v22 = vmul.f32 %v240_v21, %v239_v20 }
 0x24e   : > { %v244_v24 = vmul.f32 %v241_v22, %v222_v8  ;;  %v242_v25 = vmul.f32 %v241_v22, %v211_v0 }
 0x250   : > { %v245_v26 = vsub.f32 %v243_v23, %v244_v24 }
 0x252   : > { %v246_v27 = vadd.f32 %v245_v26, %v242_v25 }
 0x254   : > { %247 = vst [vmem:[%s210_s4] sm:$0xff] %v246_v27 }
 0x255   : > { %541 = shalt.err (!%p538_p7)
}
 0x256   : > { %s542_s17 = scalar_lea.hbm %s809_s9, 128  ;;  %s546_s24 = scalar_lea.hbm %s856_s3, 256 }
 0x257   : > { %p543_p10 = scmp.ne.s32.totalorder %s809_s9, %s542_s17  ;;  %p547_p0 = scmp.lt.u32.totalorder %s809_s9, %s856_s3 }
 0x258   : > { %p548_p11 = scmp.lt.u32.totalorder %s546_s24, %s542_s17  ;;  %p550_p2 = scmp.lt.u32.totalorder %s542_s17, %s809_s9 }
 0x259   : > { %p544_p13 = pnand %p543_p10, %p743_p6 }
 0x25a   : > { %p549_p9 = por %p548_p11, %p547_p0 }
 0x25b   : > { %p545_p5 = pneg %p544_p13 }
 0x25c   : > { %p551_p1 = por %p550_p2, %p549_p9 }
 0x25e   : > { %p552_p4 = pnand %p551_p1, %p545_p5 }
 0x260   : > { %555 = shalt.err (!%p552_p4)
}
 0x261   : > { %383 = dma.vmem_to_hbm [thread:$0]  (%p743_p6), %s811_s5, 128, %s809_s9, %s249_s10  }
 0x262 PF: > { %s274_s23 = sand.u32 1, %s586_s12   ;;  %p871_p8 = scmp.ne.s32.totalorder %s861_s19, 0 }
 0x263   : > { %p872_p12 = scmp.ge.s32.totalorder %s598_s15, 2  ;;  %s275_s28 = scalar_lea.sflag [#allocation4], %s274_s23 }
 0x265   : > { %p397_p3 = pnand %p872_p12, %p871_p8 }
 0x267   : > { %581 = dma.done.wait (!%p397_p3), %s275_s28, 128  }
 0x268   : > { %583 = vsyncadd (!%p397_p3), %s275_s28, 4294967168  ;;  %p17_p7 = scmp.ge.s32.totalorder %s680_s26, 4   ;;  %s873_s12 = smov %s590_s13 }
 0x269   : > { %s874_s13 = smov %s594_s14  ;;  %s875_s14 = smov %s739_s25 }
 0x26a   : > { %s876_s15 = smov %s680_s26  ;;  %19 = sbr.rel (!%p17_p7) target bundleno = 6 (0x6), region = 85 }
 0x271   :  { %280 = vsyncpa [#allocation3], 1 }
 0x272   :  { %282 = vsyncpa [#allocation3 + $0x1], 1 }
 0x273   :  { %283 = vsyncpa [#allocation6], 1 }
 0x274   :  { %284 = vsyncpa [#allocation4], 1 }
 0x275   :  { %286 = vsyncpa [#allocation4 + $0x1], 1 }

</bundles_post_ra>
